<compile_context>
chip_gen: v5e
topology: v5e:2x2
jax: 0.10.0
libtpu: 0.0.40
codegen_flags: <defaults>
</compile_context>

<pallas_src>
import functools

import jax
import jax.numpy as jnp
from jax.experimental import pallas as pl
from jax.experimental.pallas import tpu as pltpu

_MIN_TILE_M = 8


def sublayer_connection_kernel(x_ref, gamma_ref, beta_ref, w_ref, b_ref,
                               o_ref, n_ref, *, eps, tn):
    j = pl.program_id(1)

    # LayerNorm of this row tile is identical for every weight-column tile j;
    # compute it once per row tile and cache the bf16 MXU operand in VMEM.
    @pl.when(j == 0)
    def _():
        x = x_ref[...].astype(jnp.float32)                      # (tm, D) f32
        d = x.shape[-1]
        gamma = gamma_ref[...]                                  # (1, D) f32
        beta = beta_ref[...]                                    # (1, D) f32
        # One-pass statistics: the two XLU reductions can overlap.
        sum_x = jnp.sum(x, axis=-1, keepdims=True)
        sum_xx = jnp.sum(x * x, axis=-1, keepdims=True)
        mean = sum_x * (1.0 / d)
        # ddof=1 variance: (sum(x^2) - d*mean^2) / (d - 1); clamp tiny negatives.
        var = jnp.maximum((sum_xx - mean * sum_x) * (1.0 / (d - 1)), 0.0)
        inv = pl.reciprocal(jnp.sqrt(var) + eps, approx=False)
        n = (x - mean) * (gamma * inv) + beta                   # single broadcast site
        n_ref[...] = n.astype(jnp.bfloat16)

    # ---- SubLayer: Linear(d_model, d_model), column tile j, bf16 MXU / f32 acc ----
    sub = jnp.dot(n_ref[...], w_ref[...],
                  preferred_element_type=jnp.float32) + b_ref[...]   # (tm, tn) f32

    # ---- Dropout (eval mode => identity) + residual add on this column slice ----
    col0 = pl.multiple_of(j * tn, tn)
    x_col = x_ref[:, pl.ds(col0, tn)].astype(jnp.float32)
    o_ref[...] = (x_col + sub).astype(o_ref.dtype)


def _vmem_capacity_bytes():
    """Physical per-core VMEM; conservative 64 MiB (v7x) fallback."""
    try:
        cap = getattr(pltpu.get_tpu_info(), "vmem_capacity_bytes", None)
        if cap:
            return int(cap)
    except Exception:
        pass
    return 64 * 1024 * 1024


def _footprint_bytes(tm, tn, D, x_itemsize, out_itemsize):
    """VMEM estimate: pipeline buffers + params + scratch + live f32 temporaries."""
    w_bufs = 1 if tn == D else 2            # constant-index weight -> Buffered(1)
    return (2 * tm * D * x_itemsize         # x tile, double-buffered
            + 2 * tm * tn * out_itemsize    # out tile, double-buffered
            + w_bufs * D * tn * 2           # bf16 weight column block
            + tm * D * 2                    # bf16 LayerNorm scratch
            + 5 * tm * D * 4                # live f32 intermediates (x, x*x, n, ...)
            + 2 * D * 4 + 2 * tn * 4        # gamma/beta + bias blocks
            + (1 << 20))                    # slack


def _pick_tiles(rows, D, x_itemsize, out_itemsize, budget):
    """Largest row tile (and widest weight-column tile) fitting the VMEM budget."""
    rows8 = max(_MIN_TILE_M, pl.cdiv(rows, _MIN_TILE_M) * _MIN_TILE_M)
    tm_cap = min(rows8, 1024)
    tm_cands = sorted({t for t in (1024, 512, 256, 128, 64, 32, 16, 8)
                       if t <= tm_cap} | {tm_cap}, reverse=True)
    if D % 128 == 0:
        tn_cands = [D] + [t for t in (2048, 1024, 512, 256, 128)
                          if t < D and D % t == 0]
    else:
        tn_cands = [D]   # last block dim must be a multiple of 128 or the full extent
    for tn in tn_cands:
        for tm in tm_cands:
            if _footprint_bytes(tm, tn, D, x_itemsize, out_itemsize) <= budget:
                return tm, tn
    # Minimal config (tiny footprint for any D); vmem_limit derives from its
    # real footprint in the wrapper, so this never lies about VMEM use.
    return tm_cands[-1], tn_cands[-1]


def sublayer_connection(x, gamma, beta, w, b, *, eps=1e-6, tm=None, tn=None):
    """out = x + Linear(LayerNorm(x)) ; x: (B, S, D) -> (B, S, D)."""
    B, S, D = x.shape
    rows = B * S
    x2 = x.reshape(rows, D)
    out_dtype = x.dtype
    out_itemsize = jnp.dtype(out_dtype).itemsize

    capacity = _vmem_capacity_bytes()
    budget = (capacity * 3) // 4        # ~48 MiB on v7x, ~96 MiB on v5e/v6e
    auto_tm, auto_tn = _pick_tiles(rows, D, x.dtype.itemsize, out_itemsize, budget)
    tm = auto_tm if tm is None else tm
    tn = auto_tn if tn is None else tn

    gamma2 = gamma.reshape(1, D).astype(jnp.float32)
    beta2 = beta.reshape(1, D).astype(jnp.float32)
    b2 = b.reshape(1, D).astype(jnp.float32)
    w_bf16 = w.astype(jnp.bfloat16)     # half-size weight DMA; bf16 MXU operand

    need = _footprint_bytes(tm, tn, D, x.dtype.itemsize, out_itemsize)
    # Honest limit covering the footprint, never above physical VMEM (v7x: 64 MiB).
    vmem_limit = int(min(max(need + (2 << 20), 32 << 20), capacity - (8 << 20)))

    single = pl.Buffered(1)                    # constant blocks: no double buffer
    w_mode = single if tn == D else None       # column-tiled weight keeps prefetch

    kernel = functools.partial(sublayer_connection_kernel, eps=eps, tn=tn)

    out = pl.pallas_call(
        kernel,
        out_shape=jax.ShapeDtypeStruct((rows, D), out_dtype),
        grid_spec=pltpu.PrefetchScalarGridSpec(
            num_scalar_prefetch=0,
            grid=(pl.cdiv(rows, tm), pl.cdiv(D, tn)),
            in_specs=[
                pl.BlockSpec((tm, D), lambda i, j: (i, 0)),                        # x rows
                pl.BlockSpec((1, D), lambda i, j: (0, 0), pipeline_mode=single),   # gamma
                pl.BlockSpec((1, D), lambda i, j: (0, 0), pipeline_mode=single),   # beta
                pl.BlockSpec((D, tn), lambda i, j: (0, j), pipeline_mode=w_mode),  # weight
                pl.BlockSpec((1, tn), lambda i, j: (0, j), pipeline_mode=w_mode),  # bias
            ],
            out_specs=pl.BlockSpec((tm, tn), lambda i, j: (i, j)),
            scratch_shapes=[pltpu.VMEM((tm, D), jnp.bfloat16)],   # cached LayerNorm(x)
        ),
        compiler_params=pltpu.CompilerParams(
            dimension_semantics=("parallel", "arbitrary"),   # row tiles shard on v7x megacore
            vmem_limit_bytes=vmem_limit,
        ),
    )(x2, gamma2, beta2, w_bf16, b2)

    return out.reshape(B, S, D)


def reference(x, gamma, beta, w, b, eps=1e-6):
    xf = x.astype(jnp.float32)
    mean = jnp.mean(xf, axis=-1, keepdims=True)
    std = jnp.std(xf, axis=-1, keepdims=True, ddof=1)
    n = gamma * (xf - mean) / (std + eps) + beta
    sub = n @ w + b
    return (xf + sub).astype(x.dtype)


if __name__ == "__main__":
    key = jax.random.PRNGKey(0)
    kx, kw, kb, kx2, kx3, kw3, kb3 = jax.random.split(key, 7)

    # Small shapes consistent with the module (d_model=512 in the paper, 128 here).
    B, S, D = 2, 8, 128
    x = jax.random.normal(kx, (B, S, D), dtype=jnp.float32)
    gamma = jnp.ones((D,), jnp.float32)
    beta = jnp.zeros((D,), jnp.float32)
    w = jax.random.normal(kw, (D, D), dtype=jnp.float32) * 0.02
    b = jax.random.normal(kb, (D,), dtype=jnp.float32) * 0.02

    out = jax.block_until_ready(sublayer_connection(x, gamma, beta, w, b))
    ref = reference(x, gamma, beta, w, b)
    assert out.shape == (B, S, D)
    # bf16 MXU operands => compare with bf16-level tolerance.
    assert jnp.allclose(out, ref, atol=2e-2, rtol=2e-2), "mismatch vs reference"

    # Ragged row count (rows = 15): exercises the partial-last-block path
    # (no wrapper-side pad/slice HBM passes).
    x_odd = jax.random.normal(kx2, (3, 5, D), dtype=jnp.float32)
    out_odd = jax.block_until_ready(sublayer_connection(x_odd, gamma, beta, w, b))
    ref_odd = reference(x_odd, gamma, beta, w, b)
    assert out_odd.shape == (3, 5, D)
    assert jnp.allclose(out_odd, ref_odd, atol=2e-2, rtol=2e-2), "mismatch (ragged rows)"

    # Column-tiled path (weight tiled along N, LayerNorm cached across j tiles),
    # forced via explicit small tiles: grid = (3, 2).
    D2 = 256
    x_ct = jax.random.normal(kx3, (2, 24, D2), dtype=jnp.float32)
    gamma2 = jnp.ones((D2,), jnp.float32) * 1.1
    beta2 = jnp.ones((D2,), jnp.float32) * 0.05
    w2 = jax.random.normal(kw3, (D2, D2), dtype=jnp.float32) * 0.02
    b2 = jax.random.normal(kb3, (D2,), dtype=jnp.float32) * 0.02
    out_ct = jax.block_until_ready(
        sublayer_connection(x_ct, gamma2, beta2, w2, b2, tm=16, tn=128))
    ref_ct = reference(x_ct, gamma2, beta2, w2, b2)
    assert out_ct.shape == (2, 24, D2)
    assert jnp.allclose(out_ct, ref_ct, atol=2e-2, rtol=2e-2), "mismatch (column tiles)"

    print("KERNEL_OK")
</pallas_src>

<mosaic_0001>
module attributes {stable_mosaic.version = 11 : i64} {
  func.func @sublayer_connection_kernel(%arg0: i32, %arg1: i32, %arg2: memref<16x128xf32, #tpu.memory_space<vmem>>, %arg3: memref<1x128xf32, #tpu.memory_space<vmem>>, %arg4: memref<1x128xf32, #tpu.memory_space<vmem>>, %arg5: memref<128x128xbf16, #tpu.memory_space<vmem>>, %arg6: memref<1x128xf32, #tpu.memory_space<vmem>>, %arg7: memref<16x128xf32, #tpu.memory_space<vmem>>, %arg8: memref<16x128xbf16, #tpu.memory_space<vmem>>) attributes {dimension_semantics = [#tpu.dimension_semantics<parallel>, #tpu.dimension_semantics<arbitrary>], iteration_bounds = array<i64: 1, 1>, scalar_prefetch = 0 : i64, scratch_operands = 1 : i64, tpu.core_type = #tpu.core_type<tc>, window_params = [{transform_indices = @transform_0, window_bounds = array<i64: 16, 128>}, {pipeline_mode = #tpu.pipeline_mode<synchronous>, transform_indices = @transform_1, window_bounds = array<i64: 1, 128>}, {pipeline_mode = #tpu.pipeline_mode<synchronous>, transform_indices = @transform_2, window_bounds = array<i64: 1, 128>}, {pipeline_mode = #tpu.pipeline_mode<synchronous>, transform_indices = @transform_3, window_bounds = array<i64: 128, 128>}, {pipeline_mode = #tpu.pipeline_mode<synchronous>, transform_indices = @transform_4, window_bounds = array<i64: 1, 128>}, {transform_indices = @transform_5, window_bounds = array<i64: 16, 128>}]} {
    %c0_i32 = arith.constant 0 : i32
    %0 = arith.cmpi eq, %arg1, %c0_i32 : i32
    %1 = arith.extui %0 : i1 to i32
    %c0_i32_0 = arith.constant 0 : i32
    %2 = arith.cmpi ne, %1, %c0_i32_0 : i32
    scf.if %2 {
      %c0_9 = arith.constant 0 : index
      %c0_10 = arith.constant 0 : index
      %15 = vector.load %arg2[%c0_9, %c0_10] : memref<16x128xf32, #tpu.memory_space<vmem>>, vector<16x128xf32>
      %c0_11 = arith.constant 0 : index
      %c0_12 = arith.constant 0 : index
      %16 = vector.load %arg3[%c0_11, %c0_12] : memref<1x128xf32, #tpu.memory_space<vmem>>, vector<1x128xf32>
      %c0_13 = arith.constant 0 : index
      %c0_14 = arith.constant 0 : index
      %17 = vector.load %arg4[%c0_13, %c0_14] : memref<1x128xf32, #tpu.memory_space<vmem>>, vector<1x128xf32>
      %cst_15 = arith.constant dense<0.000000e+00> : vector<16xf32>
      %18 = vector.multi_reduction <add>, %15, %cst_15 [1] : vector<16x128xf32> to vector<16xf32>
      %19 = vector.shape_cast %18 : vector<16xf32> to vector<16x1xf32>
      %20 = arith.mulf %15, %15 : vector<16x128xf32>
      %cst_16 = arith.constant dense<0.000000e+00> : vector<16xf32>
      %21 = vector.multi_reduction <add>, %20, %cst_16 [1] : vector<16x128xf32> to vector<16xf32>
      %22 = vector.shape_cast %21 : vector<16xf32> to vector<16x1xf32>
      %cst_17 = arith.constant 7.812500e-03 : f32
      %23 = vector.broadcast %cst_17 : f32 to vector<16x1xf32>
      %24 = arith.mulf %19, %23 : vector<16x1xf32>
      %25 = arith.mulf %24, %19 : vector<16x1xf32>
      %26 = arith.subf %22, %25 : vector<16x1xf32>
      %cst_18 = arith.constant 0.00787401571 : f32
      %27 = vector.broadcast %cst_18 : f32 to vector<16x1xf32>
      %28 = arith.mulf %26, %27 : vector<16x1xf32>
      %cst_19 = arith.constant 0.000000e+00 : f32
      %29 = vector.broadcast %cst_19 : f32 to vector<16x1xf32>
      %30 = arith.maximumf %28, %29 : vector<16x1xf32>
      %31 = math.sqrt %30 : vector<16x1xf32>
      %cst_20 = arith.constant 9.99999997E-7 : f32
      %32 = vector.broadcast %cst_20 : f32 to vector<16x1xf32>
      %33 = arith.addf %31, %32 : vector<16x1xf32>
      %34 = tpu.reciprocal %33 : vector<16x1xf32> -> vector<16x1xf32>
      %35 = vector.broadcast %24 : vector<16x1xf32> to vector<16x128xf32>
      %36 = arith.subf %15, %35 : vector<16x128xf32>
      %37 = vector.broadcast %16 : vector<1x128xf32> to vector<16x128xf32>
      %38 = vector.broadcast %34 : vector<16x1xf32> to vector<16x128xf32>
      %39 = arith.mulf %37, %38 : vector<16x128xf32>
      %40 = arith.mulf %36, %39 : vector<16x128xf32>
      %41 = vector.broadcast %17 : vector<1x128xf32> to vector<16x128xf32>
      %42 = arith.addf %40, %41 : vector<16x128xf32>
      %43 = arith.truncf %42 : vector<16x128xf32> to vector<16x128xbf16>
      %c0_21 = arith.constant 0 : index
      %c0_22 = arith.constant 0 : index
      %44 = vector.load %arg8[%c0_21, %c0_22] : memref<16x128xbf16, #tpu.memory_space<vmem>>, vector<16x128xbf16>
      tpu.vector_store %arg8[%c0_21, %c0_22], %43 {strides = array<i32>} : memref<16x128xbf16, #tpu.memory_space<vmem>>, vector<16x128xbf16>,
    } else {
    }
    %c0 = arith.constant 0 : index
    %c0_1 = arith.constant 0 : index
    %3 = vector.load %arg8[%c0, %c0_1] : memref<16x128xbf16, #tpu.memory_space<vmem>>, vector<16x128xbf16>
    %c0_2 = arith.constant 0 : index
    %c0_3 = arith.constant 0 : index
    %4 = vector.load %arg5[%c0_2, %c0_3] : memref<128x128xbf16, #tpu.memory_space<vmem>>, vector<128x128xbf16>
    %cst = arith.constant dense<0.000000e+00> : vector<16x128xf32>
    %5 = tpu.matmul %3, %4, %cst {dimension_numbers = #tpu.dot_dimension_numbers<[1], [0], [0], [1], [0, 0, 1, 1], [], []>} : vector<16x128xbf16>, vector<128x128xbf16>, vector<16x128xf32> -> vector<16x128xf32>
    %c0_4 = arith.constant 0 : index
    %c0_5 = arith.constant 0 : index
    %6 = vector.load %arg6[%c0_4, %c0_5] : memref<1x128xf32, #tpu.memory_space<vmem>>, vector<1x128xf32>
    %7 = vector.broadcast %6 : vector<1x128xf32> to vector<16x128xf32>
    %8 = arith.addf %5, %7 : vector<16x128xf32>
    %c128_i32 = arith.constant 128 : i32
    %9 = arith.muli %arg1, %c128_i32 : i32
    %10 = tpu.assume_multiple %9, 128 : i32
    %c0_6 = arith.constant 0 : index
    %11 = arith.index_cast %10 : i32 to index
    %12 = vector.load %arg2[%c0_6, %11] : memref<16x128xf32, #tpu.memory_space<vmem>>, vector<16x128xf32>
    %13 = arith.addf %12, %8 : vector<16x128xf32>
    %c0_7 = arith.constant 0 : index
    %c0_8 = arith.constant 0 : index
    %14 = vector.load %arg7[%c0_7, %c0_8] : memref<16x128xf32, #tpu.memory_space<vmem>>, vector<16x128xf32>
    tpu.vector_store %arg7[%c0_7, %c0_8], %13 {strides = array<i32>} : memref<16x128xf32, #tpu.memory_space<vmem>>, vector<16x128xf32>,
    return
  }
  func.func @transform_0(%arg0: i32, %arg1: i32) -> (i32, i32) {
    %c0_i32 = arith.constant 0 : i32
    %c0_i32_0 = arith.constant 0 : i32
    return %arg0, %c0_i32 : i32, i32
  }
  func.func @transform_1(%arg0: i32, %arg1: i32) -> (i32, i32) {
    %c0_i32 = arith.constant 0 : i32
    %c0_i32_0 = arith.constant 0 : i32
    %c0_i32_1 = arith.constant 0 : i32
    return %c0_i32, %c0_i32_0 : i32, i32
  }
  func.func @transform_2(%arg0: i32, %arg1: i32) -> (i32, i32) {
    %c0_i32 = arith.constant 0 : i32
    %c0_i32_0 = arith.constant 0 : i32
    %c0_i32_1 = arith.constant 0 : i32
    return %c0_i32, %c0_i32_0 : i32, i32
  }
  func.func @transform_3(%arg0: i32, %arg1: i32) -> (i32, i32) {
    %c0_i32 = arith.constant 0 : i32
    %c0_i32_0 = arith.constant 0 : i32
    return %c0_i32, %arg1 : i32, i32
  }
  func.func @transform_4(%arg0: i32, %arg1: i32) -> (i32, i32) {
    %c0_i32 = arith.constant 0 : i32
    %c0_i32_0 = arith.constant 0 : i32
    return %c0_i32, %arg1 : i32, i32
  }
  func.func @transform_5(%arg0: i32, %arg1: i32) -> (i32, i32) {
    %c0_i32 = arith.constant 0 : i32
    return %arg0, %arg1 : i32, i32
  }
}

</mosaic_0001>

<bundles_post_ra>
// kernel: tpu_custom_call.1
= control target key start
LH: loop header
LB: loop body
LE: loop exit
PB: predicated region body
PF: predicated region fallthrough
CT: control target
= control target key end

     0   :  { %10 = vsyncpa [#allocation4], 0  ;;  %s542_s0 = inlined_call_operand.hbm [shape: f32[16,128], index: 0, kind: input, shape index: {}]   ;;  %s543_s1 = inlined_call_operand.hbm [shape: f32[1,128], index: 1, kind: input, shape index: {}]   ;;  %s544_s2 = inlined_call_operand.vmem [shape: f32[1,128], index: 2, kind: input, shape index: {}]   ;;  %s545_s3 = inlined_call_operand.hbm [shape: bf16[128,128], index: 3, kind: input, shape index: {}]   ;;  %s546_s4 = inlined_call_operand.vmem [shape: f32[1,128], index: 4, kind: input, shape index: {}]   ;;  %s547_s5 = inlined_call_operand.hbm [shape: f32[16,128], index: 5, kind: output, shape index: {}]  }
   0x1   :  { %11 = vsyncpa [#allocation7], 0  ;;  %s31_s20 = sshll.u32 %s543_s1, 4  ;;  %s32_s20 = int_to_ptr.hbm [resolvable:$true] %s31_s20 }
   0x2   :  { %12 = vsyncpa [#allocation5], 0  ;;  %s458_s21 = smov [#allocation6]   ;;  %s17_s25 = sshll.u32 %s542_s0, 4  ;;  %s18_s25 = int_to_ptr.hbm [resolvable:$true] %s17_s25 }
   0x3   :  { %s33_s22 = sshll.u32 %s458_s21, 4  ;;  %s459_s26 = smov [#allocation3]   ;;  %s34_s22 = int_to_ptr.vmem [resolvable:$true] %s33_s22 }
   0x4   :  { %36 = dma.hbm_to_vmem [thread:$0]  %s32_s20, 16, %s34_s22, [#allocation7]  }
   0x5   :  { %s19_s27 = sshll.u32 %s459_s26, 4  ;;  %s460_s28 = smov 128   ;;  %s20_s27 = int_to_ptr.vmem [resolvable:$true] %s19_s27 }
   0x6   :  { %s461_s29 = smov 8   ;;  %s43_s6 = sshll.u32 %s545_s3, 4  ;;  %s44_s6 = int_to_ptr.hbm [resolvable:$true] %s43_s6 }
   0x7   :  { %25 = dma.hbm_to_vmem [thread:$0]  %s18_s25, 256, %s20_s27, [#allocation4], %s460_s28, %s460_s28, %s461_s29  }
   0x8   :  { %s462_s7 = smov [#allocation8]   ;;  %s463_s0 = smov 64  }
   0x9   :  { %s45_s8 = sshll.u32 %s462_s7, 4  ;;  %s464_s9 = smov 4   ;;  %s46_s8 = int_to_ptr.vmem [resolvable:$true] %s45_s8 }
   0xa   :  { %51 = dma.hbm_to_vmem [thread:$0]  %s44_s6, 1024, %s46_s8, [#allocation7], %s463_s0, %s463_s0, %s464_s9  }
   0xb   :  { %452 = dma.done.wait [#allocation4], 256  }
   0xc   :  { %453 = vsyncadd [#allocation4], 4294967040 }
   0xd   :  { %454 = dma.done.wait [#allocation7], 1040  }
   0xe   :  { %455 = vsyncadd [#allocation7], 4294966256  ;;  %v508_v0 = vld [vmem:[#allocation3] sm:$0xff]  ;;  %v513_v2 = vld [vmem:[#allocation3 + $0x8] sm:$0xff]  ;;  %s465_s13 = smov [#allocation9]   ;;  %s272_s16 = sshll.u32 %s547_s5, 4  ;;  %s273_s16 = int_to_ptr.hbm [resolvable:$true] %s272_s16 }
   0xf   :  { %74 = vadd.xlane.f32.xlu0 %v508_v0  ;;  %v78_v1 = vmul.f32 %v508_v0, %v508_v0  ;;  %v79_v3 = vmul.f32 %v513_v2, %v513_v2  ;;  %v331_v15 = vld [vmem:[#allocation8 + $0x38] sm:$0xff]  ;;  %v330_v19 = vld [vmem:[#allocation8 + $0x30] sm:$0xff]  ;;  %v329_v23 = vld [vmem:[#allocation8 + $0x28] sm:$0xff]  ;;  %s270_s14 = sshll.u32 %s465_s13, 4  ;;  %s271_s14 = int_to_ptr.vmem [resolvable:$true] %s270_s14 }
  0x10   :  { %242 = vmatpush.bf16.msra.mxu0 %v331_v15  ;;  %v328_v26 = vld [vmem:[#allocation8 + $0x20] sm:$0xff]  ;;  %v327_v30 = vld [vmem:[#allocation8 + $0x18] sm:$0xff]  ;;  %v326_v37 = vld [vmem:[#allocation8 + $0x10] sm:$0xff] }
  0x11   :  { %80 = vadd.xlane.f32.xlu1 %v78_v1  ;;  %v325_v41 = vld [vmem:[#allocation8 + $0x8] sm:$0xff]  ;;  %v324_v45 = vld [vmem:[#allocation8] sm:$0xff]  ;;  %v345_v60 = vld [vmem:[#allocation6] ss:$0 sm:$0xff] }
  0x14   :  { %243 = vmatpush.bf16.msra.mxu0 %v330_v19 }
  0x17   :  { %76 = vadd.xlane.f32.xlu0 %v513_v2 }
  0x18   :  { %244 = vmatpush.bf16.msra.mxu0 %v329_v23 }
  0x19   :  { %82 = vadd.xlane.f32.xlu1 %v79_v3 }
  0x1c   :  { %245 = vmatpush.bf16.msra.mxu0 %v328_v26 }
  0x20   :  { %246 = vmatpush.bf16.msra.mxu0 %v327_v30 }
  0x24   :  { %247 = vmatpush.bf16.msra.mxu0 %v326_v37 }
  0x28   :  { %248 = vmatpush.bf16.msra.mxu0 %v325_v41 }
  0x2c   :  { %249 = vmatpush.bf16.msra.mxu0 %v324_v45 }
  0x82   :  { %v75_v4 = vpop.xlane.xlu0 %74 }
  0x83   :  { %v518_v5 = vmul.f32 0.0078125, %v75_v4 }
  0x84   :  { %v81_v6 = vpop.xlane.xlu1 %80 }
  0x85   :  { %v86_v7 = vmul.f32 %v518_v5, %v75_v4 }
  0x87   :  { %v88_v8 = vsub.f32 %v81_v6, %v86_v7  ;;  %v148_v7 = vsub.f32 %v508_v0, %v518_v5  ;;  %v347_v5 = vld [vmem:[%s546_s4] ss:$0 sm:$0xff] }
  0x89   :  { %v90_v9 = vmul.f32 0.007874016, %v88_v8 }
  0x8a   :  { %v77_v10 = vpop.xlane.xlu0 %76 }
  0x8b   :  { %v92_v11 = vmax.f32 %v90_v9, 0.0  ;;  %v521_v12 = vmul.f32 0.0078125, %v77_v10 }
  0x8c   :  { %v83_v13 = vpop.xlane.xlu1 %82 }
  0x8d   :  { %348 = vrsqrt.f32 %v92_v11  ;;  %v87_v14 = vmul.f32 %v521_v12, %v77_v10  ;;  %vm101_vm0 = vcmp.eq.f32.partialorder %v92_v11, inf  ;;  %v104_v32 = vand.u32 2147483648, %v92_v11 }
  0x8e   :  { %vm103_vm1 = vcmp.eq.f32.partialorder %v92_v11, 0.0  ;;  %v149_v10 = vsub.f32 %v513_v2, %v521_v12 }
  0x8f   :  { %v89_v16 = vsub.f32 %v83_v13, %v87_v14  ;;  %v346_v14 = vld [vmem:[%s544_s2] ss:$0 sm:$0xff] }
  0x91   :  { %v91_v17 = vmul.f32 0.007874016, %v89_v16 }
  0x93   :  { %v349_v18 = vpop.eup %348  ;;  %v93_v21 = vmax.f32 %v91_v17, 0.0 }
  0x94   :  { %v95_v20 = vmul.f32 %v349_v18, %v92_v11 }
  0x95   :  { %350 = vrsqrt.f32 %v93_v21  ;;  %vm113_vm2 = vcmp.eq.f32.partialorder %v93_v21, inf  ;;  %v116_v43 = vand.u32 2147483648, %v93_v21  ;;  %vm115_vm3 = vcmp.eq.f32.partialorder %v93_v21, 0.0 }
  0x96   :  { %v96_v22 = vmul.f32 %v349_v18, %v95_v20 }
  0x98   :  { %v97_v24 = vmul.f32 0.5, %v96_v22 }
  0x9a   :  { %v98_v25 = vsub.f32 1.5, %v97_v24 }
  0x9b   :  { %v351_v27 = vpop.eup %350 }
  0x9c   :  { %v99_v28 = vmul.f32 %v349_v18, %v98_v25  ;;  %v107_v29 = vmul.f32 %v351_v27, %v93_v21 }
  0x9e   :  { %v100_v31 = vmul.f32 %v99_v28, %v92_v11  ;;  %v108_v33 = vmul.f32 %v351_v27, %v107_v29 }
  0xa0   :  { %v102_v34 = vsel %vm101_vm0, %v92_v11, %v100_v31  ;;  %v109_v36 = vmul.f32 0.5, %v108_v33 }
  0xa1   :  { %v105_v35 = vsel %vm103_vm1, %v104_v32, %v102_v34 }
  0xa2   :  { %v118_v38 = vadd.f32 1e-06, %v105_v35  ;;  %v110_v39 = vsub.f32 1.5, %v109_v36 }
  0xa4   :  { %352 = vrcp.f32 %v118_v38  ;;  %v111_v40 = vmul.f32 %v351_v27, %v110_v39  ;;  %v131_v53 = vand.u32 2147483648, %v118_v38  ;;  %vm125_vm5 = vweird.f32 %v118_v38 }
  0xa5   :  { %v129_v54 = vand.u32 2147483647, %v118_v38 }
  0xa6   :  { %v112_v42 = vmul.f32 %v111_v40, %v93_v21  ;;  %v132_v58 = vor.u32 1.1754944e-38, %v131_v53 }
  0xa7   :  { %vm130_vm7 = vcmp.eq.f32.partialorder %v129_v54, 8.507059e+37 }
  0xa8   :  { %v114_v44 = vsel %vm113_vm2, %v93_v21, %v112_v42 }
  0xa9   :  { %v117_v47 = vsel %vm115_vm3, %v116_v43, %v114_v44 }
  0xaa   :  { %v353_v46 = vpop.eup %352  ;;  %v119_v49 = vadd.f32 1e-06, %v117_v47 }
  0xab   :  { %v121_v48 = vmul.f32 %v353_v46, %v118_v38  ;;  %vm126_vm4 = vweird.f32 %v353_v46 }
  0xac   :  { %354 = vrcp.f32 %v119_v49  ;;  %vm127_vm6 = vmor %vm125_vm5, %vm126_vm4  ;;  %v145_v61 = vand.u32 2147483648, %v119_v49  ;;  %v143_v1 = vand.u32 2147483647, %v119_v49  ;;  %vm139_vm9 = vweird.f32 %v119_v49 }
  0xad   :  { %v122_v50 = vsub.f32 1.0, %v121_v48 }
  0xae   :  { %v146_v6 = vor.u32 1.1754944e-38, %v145_v61  ;;  %vm144_vm11 = vcmp.eq.f32.partialorder %v143_v1, 8.507059e+37 }
  0xaf   :  { %v123_v51 = vmul.f32 %v353_v46, %v122_v50 }
  0xb1   :  { %v124_v52 = vadd.f32 %v353_v46, %v123_v51 }
  0xb2   :  { %v355_v55 = vpop.eup %354 }
  0xb3   :  { %v128_v56 = vsel %vm127_vm6, %v353_v46, %v124_v52  ;;  %v135_v57 = vmul.f32 %v355_v55, %v119_v49  ;;  %vm140_vm8 = vweird.f32 %v355_v55 }
  0xb4   :  { %v133_v62 = vsel %vm130_vm7, %v132_v58, %v128_v56  ;;  %vm141_vm10 = vmor %vm139_vm9, %vm140_vm8 }
  0xb5   :  { %v136_v59 = vsub.f32 1.0, %v135_v57  ;;  %v153_v4 = vmul.f32 %v345_v60, %v133_v62 }
  0xb7   :  { %v137_v63 = vmul.f32 %v355_v55, %v136_v59  ;;  %v155_v13 = vmul.f32 %v153_v4, %v148_v7 }
  0xb9   :  { %v138_v3 = vadd.f32 %v355_v55, %v137_v63  ;;  %v160_v16 = vadd.f32 %v346_v14, %v155_v13 }
  0xbb   :  { %v142_v8 = vsel %vm141_vm10, %v355_v55, %v138_v3 }
  0xbc   :  { %v147_v9 = vsel %vm144_vm11, %v146_v6, %v142_v8 }
  0xbd   :  { %v154_v11 = vmul.f32 %v345_v60, %v147_v9 }
  0xbf   :  { %v156_v15 = vmul.f32 %v154_v11, %v149_v10 }
  0xc1   :  { %v161_v17 = vadd.f32 %v346_v14, %v156_v15 }
  0xc3   :  { %v335_v18 = vpack.c.bf16 %v161_v17, %v160_v16 }
  0xc5   :  { %336 = vst [vmem:[#allocation2] sm:$0xff] %v335_v18  }
  0xcc   :  { %v323_v19 = vld [vmem:[#allocation2] sm:$0xff] }
  0xcd   :  { %250 = vmatmul.bf16.vlgmr.msra.gmra.mxu0 %v323_v19 }
 0x14a   :  { %v251_v20 = vpop.f32.mrf.mxu0 }
 0x14b   :  { %v252_v21 = vadd.f32 %v347_v5, %v251_v20 }
 0x14d   :  { %v262_v12 = vadd.f32 %v252_v21, %v508_v0 }
 0x14f   :  { %264 = vst [vmem:[#allocation9] sm:$0xff] %v262_v12 }
 0x152   :  { %v253_v22 = vpop.f32.mrf.mxu0 }
 0x153   :  { %v254_v23 = vadd.f32 %v347_v5, %v253_v22 }
 0x155   :  { %v263_v24 = vadd.f32 %v254_v23, %v513_v2 }
 0x157   :  { %265 = vst [vmem:[#allocation9 + $0x8] sm:$0xff] %v263_v24 }
 0x158   :  { %278 = dma.vmem_to_hbm [thread:$0]  %s271_s14, 256, %s273_s16, [#allocation5], %s460_s28, %s460_s28, %s461_s29  }
 0x159   :  { %456 = dma.done.wait [#allocation5], 256  }
 0x15a   :  { %457 = vsyncadd [#allocation5], 4294967040 }
 0x15b   :  { %283 = vsyncpa [#allocation4], 1 }
 0x15c   :  { %284 = vsyncpa [#allocation7], 1 }
 0x15d   :  { %285 = vsyncpa [#allocation5], 1 }

</bundles_post_ra>
